<compile_context>
chip_gen: v5e
topology: v5e:2x2
jax: 0.10.0
libtpu: 0.0.40
codegen_flags: <defaults>
</compile_context>

<pallas_src>
import jax
import jax.numpy as jnp
from jax.experimental import pallas as pl
from jax.experimental.pallas import tpu as pltpu


def _round_up(x, m):
    return ((x + m - 1) // m) * m


def _cexdl_partial_kernel(x_ref, t_ref, out_ref, ce_acc, inter_acc, pt_acc):
    """Grid = (batch, outer spatial chunk, inner spatial tile); axis 2 reduces."""
    j = pl.program_id(2)

    @pl.when(j == 0)
    def _init():
        ce_acc[...] = jnp.zeros_like(ce_acc)
        inter_acc[...] = jnp.zeros_like(inter_acc)
        pt_acc[...] = jnp.zeros_like(pt_acc)

    x = x_ref[...].astype(jnp.float32)   # (C, TS, 128) logits
    t = t_ref[...].astype(jnp.float32)   # (C, TS, 128) soft targets

    # Per-pixel reductions over the class axis (leading, untiled) -> pure VPU.
    m = jnp.max(x, axis=0)                                       # (TS, 128)
    lse = jnp.log(jnp.sum(jnp.exp(x - m[None, :, :]), axis=0)) + m
    st = jnp.sum(t, axis=0)                                      # sum_c t
    tx = jnp.sum(t * x, axis=0)                                  # sum_c t*x
    ce = lse * st - tx            # == -sum_c t * log_softmax(x), per pixel

    p = jax.nn.sigmoid(x)
    inter = jnp.sum(p * t, axis=0)                               # sum_c p*t
    pt = jnp.sum(p, axis=0) + st                                 # sum_c (p + t)

    ts = x.shape[1]

    def fold(v):  # (TS, 128) -> (8, 128): tile-preserving reshape + full-vreg adds
        return v.reshape(ts // 8, 8, 128).sum(axis=0)

    ce_acc[...] += fold(ce)
    inter_acc[...] += fold(inter)
    pt_acc[...] += fold(pt)

    @pl.when(j == pl.num_programs(2) - 1)
    def _finalize():
        out_ref[0] = ce_acc[...]
        out_ref[1] = inter_acc[...]
        out_ref[2] = pt_acc[...]


def cexdl_loss(inputs_nchw, targets_nchw, *, alpha=0.5, smooth=1e-5,
               vmem_input_budget_bytes=8 * 1024 * 1024):
    """CExDL forward. inputs/targets: (N, C, H, W); targets are per-pixel class probs."""
    N, C, H, W = inputs_nchw.shape
    HW = H * W
    itemsize = jnp.dtype(inputs_nchw.dtype).itemsize

    # --- spatial tiling: lane-rows of 128 pixels, TS rows (multiple of 8) per block.
    L = -(-HW // 128)                                      # lane-rows needed
    # Budget covers 2 inputs x 2 pipeline buffers of (C, TS, 128) each.
    ts_budget = vmem_input_budget_bytes // (4 * C * 128 * itemsize)
    ts_budget = max(8, (ts_budget // 8) * 8)
    TS = min(ts_budget, _round_up(L, 8))
    # Prefer >= 2 spatial chunks so both v7x TensorCores get work even at N == 1.
    if TS >= L and L > 8:
        TS = max(8, _round_up(-(-L // 2), 8))
    n_tiles = -(-L // TS)
    n_outer = 2 if n_tiles >= 2 else 1
    n_inner = -(-n_tiles // n_outer)
    L_pad = n_outer * n_inner * TS
    HW_pad = L_pad * 128
    pad = HW_pad - HW

    # Glue: contiguous reshape; zero-pad the spatial tail only when needed.
    x = inputs_nchw.reshape(N, C, HW)
    t = targets_nchw.reshape(N, C, HW)
    if pad:
        # Zero padding is exact for CE / intersection / sum(t); the only padded
        # contribution is sigmoid(0) = 0.5 to sum(p), corrected in the epilogue.
        x = jnp.pad(x, ((0, 0), (0, 0), (0, pad)))
        t = jnp.pad(t, ((0, 0), (0, 0), (0, pad)))
    x = x.reshape(N, C, L_pad, 128)
    t = t.reshape(N, C, L_pad, 128)

    partials = pl.pallas_call(
        _cexdl_partial_kernel,
        out_shape=jax.ShapeDtypeStruct((N, n_outer, 3, 8, 128), jnp.float32),
        grid_spec=pltpu.PrefetchScalarGridSpec(
            num_scalar_prefetch=0,
            grid=(N, n_outer, n_inner),
            in_specs=[
                pl.BlockSpec((None, C, TS, 128),
                             lambda b, o, j: (b, 0, o * n_inner + j, 0)),
                pl.BlockSpec((None, C, TS, 128),
                             lambda b, o, j: (b, 0, o * n_inner + j, 0)),
            ],
            out_specs=pl.BlockSpec((None, None, 3, 8, 128),
                                   lambda b, o, j: (b, o, 0, 0, 0)),
            scratch_shapes=[
                pltpu.VMEM((8, 128), jnp.float32),
                pltpu.VMEM((8, 128), jnp.float32),
                pltpu.VMEM((8, 128), jnp.float32),
            ],
        ),
        compiler_params=pltpu.CompilerParams(
            dimension_semantics=("parallel", "parallel", "arbitrary"),
            vmem_limit_bytes=32 * 1024 * 1024),
    )(x, t)

    # Tiny scalar epilogue in plain JAX.
    sums = jnp.sum(partials, axis=(0, 1, 3, 4))      # (3,): ce, intersection, p+t
    ce_sum, inter_sum, pt_sum = sums[0], sums[1], sums[2]
    if pad:
        pt_sum = pt_sum - jnp.float32(0.5 * N * C * pad)   # remove sigmoid(0) of padding

    ce = ce_sum / jnp.float32(N * HW)                       # mean over N*H*W pixels
    dice = (2.0 * inter_sum + smooth) / (pt_sum + smooth)
    dice_loss = 1.0 - dice
    return alpha * ce + (1.0 - alpha) * dice_loss


def cexdl_reference(inputs_nchw, targets_nchw, alpha=0.5, smooth=1e-5):
    """Plain-JAX reference matching the PyTorch module semantics."""
    x = inputs_nchw.astype(jnp.float32)
    t = targets_nchw.astype(jnp.float32)
    log_sm = jax.nn.log_softmax(x, axis=1)
    ce = jnp.mean(jnp.sum(-t * log_sm, axis=1))
    p = jax.nn.sigmoid(x).reshape(-1)
    tf = t.reshape(-1)
    intersection = jnp.sum(p * tf)
    dice = (2.0 * intersection + smooth) / (jnp.sum(p) + jnp.sum(tf) + smooth)
    return alpha * ce + (1.0 - alpha) * (1.0 - dice)


if __name__ == "__main__":
    key = jax.random.PRNGKey(0)
    k1, k2 = jax.random.split(key)
    N, C, H, W = 2, 4, 16, 16
    inputs = jax.random.normal(k1, (N, C, H, W), dtype=jnp.float32)
    # Soft per-pixel class-probability targets (same shape as inputs).
    targets = jax.nn.softmax(
        jax.random.normal(k2, (N, C, H, W), dtype=jnp.float32), axis=1)

    loss = cexdl_loss(inputs, targets, alpha=0.5)
    loss = jax.block_until_ready(loss)

    ref = cexdl_reference(inputs, targets, alpha=0.5)
    assert jnp.allclose(loss, ref, rtol=1e-4, atol=1e-5), (loss, ref)
    print("KERNEL_OK")
</pallas_src>

<mosaic_0001>
module attributes {stable_mosaic.version = 11 : i64} {
  func.func @_cexdl_partial_kernel(%arg0: i32, %arg1: i32, %arg2: i32, %arg3: memref<1x4x8x128xf32, #tpu.memory_space<vmem>>, %arg4: memref<1x4x8x128xf32, #tpu.memory_space<vmem>>, %arg5: memref<1x1x3x8x128xf32, #tpu.memory_space<vmem>>, %arg6: memref<8x128xf32, #tpu.memory_space<vmem>>, %arg7: memref<8x128xf32, #tpu.memory_space<vmem>>, %arg8: memref<8x128xf32, #tpu.memory_space<vmem>>) attributes {dimension_semantics = [#tpu.dimension_semantics<parallel>, #tpu.dimension_semantics<parallel>, #tpu.dimension_semantics<arbitrary>], iteration_bounds = array<i64: 2, 1, 1>, scalar_prefetch = 0 : i64, scratch_operands = 3 : i64, tpu.core_type = #tpu.core_type<tc>, window_params = [{transform_indices = @transform_0, window_bounds = array<i64: 1, 4, 8, 128>}, {transform_indices = @transform_1, window_bounds = array<i64: 1, 4, 8, 128>}, {transform_indices = @transform_2, window_bounds = array<i64: 1, 1, 3, 8, 128>}]} {
    %c0_i32 = arith.constant 0 : i32
    %0 = arith.cmpi eq, %arg2, %c0_i32 : i32
    %1 = arith.extui %0 : i1 to i32
    %c0_i32_0 = arith.constant 0 : i32
    %2 = arith.cmpi ne, %1, %c0_i32_0 : i32
    scf.if %2 {
      %cst_31 = arith.constant 0.000000e+00 : f32
      %47 = vector.broadcast %cst_31 : f32 to vector<8x128xf32>
      %c0_32 = arith.constant 0 : index
      %c0_33 = arith.constant 0 : index
      %48 = vector.load %arg6[%c0_32, %c0_33] : memref<8x128xf32, #tpu.memory_space<vmem>>, vector<8x128xf32>
      tpu.vector_store %arg6[%c0_32, %c0_33], %47 {strides = array<i32>} : memref<8x128xf32, #tpu.memory_space<vmem>>, vector<8x128xf32>,
      %cst_34 = arith.constant 0.000000e+00 : f32
      %49 = vector.broadcast %cst_34 : f32 to vector<8x128xf32>
      %c0_35 = arith.constant 0 : index
      %c0_36 = arith.constant 0 : index
      %50 = vector.load %arg7[%c0_35, %c0_36] : memref<8x128xf32, #tpu.memory_space<vmem>>, vector<8x128xf32>
      tpu.vector_store %arg7[%c0_35, %c0_36], %49 {strides = array<i32>} : memref<8x128xf32, #tpu.memory_space<vmem>>, vector<8x128xf32>,
      %cst_37 = arith.constant 0.000000e+00 : f32
      %51 = vector.broadcast %cst_37 : f32 to vector<8x128xf32>
      %c0_38 = arith.constant 0 : index
      %c0_39 = arith.constant 0 : index
      %52 = vector.load %arg8[%c0_38, %c0_39] : memref<8x128xf32, #tpu.memory_space<vmem>>, vector<8x128xf32>
      tpu.vector_store %arg8[%c0_38, %c0_39], %51 {strides = array<i32>} : memref<8x128xf32, #tpu.memory_space<vmem>>, vector<8x128xf32>,
    } else {
    }
    %c0 = arith.constant 0 : index
    %c0_1 = arith.constant 0 : index
    %c0_2 = arith.constant 0 : index
    %c0_3 = arith.constant 0 : index
    %3 = vector.load %arg3[%c0, %c0_1, %c0_2, %c0_3] : memref<1x4x8x128xf32, #tpu.memory_space<vmem>>, vector<1x4x8x128xf32>
    %4 = vector.shape_cast %3 : vector<1x4x8x128xf32> to vector<4x8x128xf32>
    %c0_4 = arith.constant 0 : index
    %c0_5 = arith.constant 0 : index
    %c0_6 = arith.constant 0 : index
    %c0_7 = arith.constant 0 : index
    %5 = vector.load %arg4[%c0_4, %c0_5, %c0_6, %c0_7] : memref<1x4x8x128xf32, #tpu.memory_space<vmem>>, vector<1x4x8x128xf32>
    %6 = vector.shape_cast %5 : vector<1x4x8x128xf32> to vector<4x8x128xf32>
    %cst = arith.constant dense<0xFF800000> : vector<8x128xf32>
    %7 = vector.multi_reduction <maximumf>, %4, %cst [0] : vector<4x8x128xf32> to vector<8x128xf32>
    %8 = vector.shape_cast %7 : vector<8x128xf32> to vector<1x8x128xf32>
    %9 = vector.broadcast %8 : vector<1x8x128xf32> to vector<4x8x128xf32>
    %10 = arith.subf %4, %9 : vector<4x8x128xf32>
    %11 = math.exp %10 : vector<4x8x128xf32>
    %cst_8 = arith.constant dense<0.000000e+00> : vector<8x128xf32>
    %12 = vector.multi_reduction <add>, %11, %cst_8 [0] : vector<4x8x128xf32> to vector<8x128xf32>
    %13 = math.log %12 : vector<8x128xf32>
    %14 = arith.addf %13, %7 : vector<8x128xf32>
    %cst_9 = arith.constant dense<0.000000e+00> : vector<8x128xf32>
    %15 = vector.multi_reduction <add>, %6, %cst_9 [0] : vector<4x8x128xf32> to vector<8x128xf32>
    %16 = arith.mulf %6, %4 : vector<4x8x128xf32>
    %cst_10 = arith.constant dense<0.000000e+00> : vector<8x128xf32>
    %17 = vector.multi_reduction <add>, %16, %cst_10 [0] : vector<4x8x128xf32> to vector<8x128xf32>
    %18 = arith.mulf %14, %15 : vector<8x128xf32>
    %19 = arith.subf %18, %17 : vector<8x128xf32>
    %20 = arith.negf %4 : vector<4x8x128xf32>
    %21 = math.exp %20 : vector<4x8x128xf32>
    %cst_11 = arith.constant 1.000000e+00 : f32
    %22 = vector.broadcast %cst_11 : f32 to vector<4x8x128xf32>
    %23 = arith.addf %22, %21 : vector<4x8x128xf32>
    %24 = arith.divf %22, %23 : vector<4x8x128xf32>
    %25 = arith.mulf %24, %6 : vector<4x8x128xf32>
    %cst_12 = arith.constant dense<0.000000e+00> : vector<8x128xf32>
    %26 = vector.multi_reduction <add>, %25, %cst_12 [0] : vector<4x8x128xf32> to vector<8x128xf32>
    %cst_13 = arith.constant dense<0.000000e+00> : vector<8x128xf32>
    %27 = vector.multi_reduction <add>, %24, %cst_13 [0] : vector<4x8x128xf32> to vector<8x128xf32>
    %28 = arith.addf %27, %15 : vector<8x128xf32>
    %c0_14 = arith.constant 0 : index
    %c0_15 = arith.constant 0 : index
    %29 = vector.load %arg6[%c0_14, %c0_15] : memref<8x128xf32, #tpu.memory_space<vmem>>, vector<8x128xf32>
    %30 = vector.shape_cast %19 : vector<8x128xf32> to vector<1x8x128xf32>
    %cst_16 = arith.constant dense<0.000000e+00> : vector<8x128xf32>
    %31 = vector.multi_reduction <add>, %30, %cst_16 [0] : vector<1x8x128xf32> to vector<8x128xf32>
    %32 = arith.addf %29, %31 : vector<8x128xf32>
    %c0_17 = arith.constant 0 : index
    %c0_18 = arith.constant 0 : index
    %33 = vector.load %arg6[%c0_17, %c0_18] : memref<8x128xf32, #tpu.memory_space<vmem>>, vector<8x128xf32>
    tpu.vector_store %arg6[%c0_17, %c0_18], %32 {strides = array<i32>} : memref<8x128xf32, #tpu.memory_space<vmem>>, vector<8x128xf32>,
    %c0_19 = arith.constant 0 : index
    %c0_20 = arith.constant 0 : index
    %34 = vector.load %arg7[%c0_19, %c0_20] : memref<8x128xf32, #tpu.memory_space<vmem>>, vector<8x128xf32>
    %35 = vector.shape_cast %26 : vector<8x128xf32> to vector<1x8x128xf32>
    %cst_21 = arith.constant dense<0.000000e+00> : vector<8x128xf32>
    %36 = vector.multi_reduction <add>, %35, %cst_21 [0] : vector<1x8x128xf32> to vector<8x128xf32>
    %37 = arith.addf %34, %36 : vector<8x128xf32>
    %c0_22 = arith.constant 0 : index
    %c0_23 = arith.constant 0 : index
    %38 = vector.load %arg7[%c0_22, %c0_23] : memref<8x128xf32, #tpu.memory_space<vmem>>, vector<8x128xf32>
    tpu.vector_store %arg7[%c0_22, %c0_23], %37 {strides = array<i32>} : memref<8x128xf32, #tpu.memory_space<vmem>>, vector<8x128xf32>,
    %c0_24 = arith.constant 0 : index
    %c0_25 = arith.constant 0 : index
    %39 = vector.load %arg8[%c0_24, %c0_25] : memref<8x128xf32, #tpu.memory_space<vmem>>, vector<8x128xf32>
    %40 = vector.shape_cast %28 : vector<8x128xf32> to vector<1x8x128xf32>
    %cst_26 = arith.constant dense<0.000000e+00> : vector<8x128xf32>
    %41 = vector.multi_reduction <add>, %40, %cst_26 [0] : vector<1x8x128xf32> to vector<8x128xf32>
    %42 = arith.addf %39, %41 : vector<8x128xf32>
    %c0_27 = arith.constant 0 : index
    %c0_28 = arith.constant 0 : index
    %43 = vector.load %arg8[%c0_27, %c0_28] : memref<8x128xf32, #tpu.memory_space<vmem>>, vector<8x128xf32>
    tpu.vector_store %arg8[%c0_27, %c0_28], %42 {strides = array<i32>} : memref<8x128xf32, #tpu.memory_space<vmem>>, vector<8x128xf32>,
    %c0_i32_29 = arith.constant 0 : i32
    %44 = arith.cmpi eq, %arg2, %c0_i32_29 : i32
    %45 = arith.extui %44 : i1 to i32
    %c0_i32_30 = arith.constant 0 : i32
    %46 = arith.cmpi ne, %45, %c0_i32_30 : i32
    scf.if %46 {
      %c0_31 = arith.constant 0 : index
      %c0_32 = arith.constant 0 : index
      %47 = vector.load %arg6[%c0_31, %c0_32] : memref<8x128xf32, #tpu.memory_space<vmem>>, vector<8x128xf32>
      %c0_33 = arith.constant 0 : index
      %c0_34 = arith.constant 0 : index
      %c0_35 = arith.constant 0 : index
      %c0_36 = arith.constant 0 : index
      %c0_37 = arith.constant 0 : index
      %48 = vector.load %arg5[%c0_33, %c0_34, %c0_35, %c0_36, %c0_37] : memref<1x1x3x8x128xf32, #tpu.memory_space<vmem>>, vector<1x1x1x8x128xf32>
      %49 = vector.shape_cast %48 : vector<1x1x1x8x128xf32> to vector<8x128xf32>
      %50 = vector.shape_cast %47 : vector<8x128xf32> to vector<1x1x1x8x128xf32>
      tpu.vector_store %arg5[%c0_33, %c0_34, %c0_35, %c0_36, %c0_37], %50 {strides = array<i32>} : memref<1x1x3x8x128xf32, #tpu.memory_space<vmem>>, vector<1x1x1x8x128xf32>,
      %c0_38 = arith.constant 0 : index
      %c0_39 = arith.constant 0 : index
      %51 = vector.load %arg7[%c0_38, %c0_39] : memref<8x128xf32, #tpu.memory_space<vmem>>, vector<8x128xf32>
      %c0_40 = arith.constant 0 : index
      %c0_41 = arith.constant 0 : index
      %c1 = arith.constant 1 : index
      %c0_42 = arith.constant 0 : index
      %c0_43 = arith.constant 0 : index
      %52 = vector.load %arg5[%c0_40, %c0_41, %c1, %c0_42, %c0_43] : memref<1x1x3x8x128xf32, #tpu.memory_space<vmem>>, vector<1x1x1x8x128xf32>
      %53 = vector.shape_cast %52 : vector<1x1x1x8x128xf32> to vector<8x128xf32>
      %54 = vector.shape_cast %51 : vector<8x128xf32> to vector<1x1x1x8x128xf32>
      tpu.vector_store %arg5[%c0_40, %c0_41, %c1, %c0_42, %c0_43], %54 {strides = array<i32>} : memref<1x1x3x8x128xf32, #tpu.memory_space<vmem>>, vector<1x1x1x8x128xf32>,
      %c0_44 = arith.constant 0 : index
      %c0_45 = arith.constant 0 : index
      %55 = vector.load %arg8[%c0_44, %c0_45] : memref<8x128xf32, #tpu.memory_space<vmem>>, vector<8x128xf32>
      %c0_46 = arith.constant 0 : index
      %c0_47 = arith.constant 0 : index
      %c2 = arith.constant 2 : index
      %c0_48 = arith.constant 0 : index
      %c0_49 = arith.constant 0 : index
      %56 = vector.load %arg5[%c0_46, %c0_47, %c2, %c0_48, %c0_49] : memref<1x1x3x8x128xf32, #tpu.memory_space<vmem>>, vector<1x1x1x8x128xf32>
      %57 = vector.shape_cast %56 : vector<1x1x1x8x128xf32> to vector<8x128xf32>
      %58 = vector.shape_cast %55 : vector<8x128xf32> to vector<1x1x1x8x128xf32>
      tpu.vector_store %arg5[%c0_46, %c0_47, %c2, %c0_48, %c0_49], %58 {strides = array<i32>} : memref<1x1x3x8x128xf32, #tpu.memory_space<vmem>>, vector<1x1x1x8x128xf32>,
    } else {
    }
    return
  }
  func.func @transform_0(%arg0: i32, %arg1: i32, %arg2: i32) -> (i32, i32, i32, i32) {
    %c1_i32 = arith.constant 1 : i32
    %0 = arith.muli %arg1, %c1_i32 : i32
    %1 = arith.addi %0, %arg2 : i32
    %c0_i32 = arith.constant 0 : i32
    %c0_i32_0 = arith.constant 0 : i32
    %c0_i32_1 = arith.constant 0 : i32
    return %arg0, %c0_i32, %1, %c0_i32_0 : i32, i32, i32, i32
  }
  func.func @transform_1(%arg0: i32, %arg1: i32, %arg2: i32) -> (i32, i32, i32, i32) {
    %c1_i32 = arith.constant 1 : i32
    %0 = arith.muli %arg1, %c1_i32 : i32
    %1 = arith.addi %0, %arg2 : i32
    %c0_i32 = arith.constant 0 : i32
    %c0_i32_0 = arith.constant 0 : i32
    %c0_i32_1 = arith.constant 0 : i32
    return %arg0, %c0_i32, %1, %c0_i32_0 : i32, i32, i32, i32
  }
  func.func @transform_2(%arg0: i32, %arg1: i32, %arg2: i32) -> (i32, i32, i32, i32, i32) {
    %c0_i32 = arith.constant 0 : i32
    %c0_i32_0 = arith.constant 0 : i32
    %c0_i32_1 = arith.constant 0 : i32
    %c0_i32_2 = arith.constant 0 : i32
    return %arg0, %arg1, %c0_i32, %c0_i32_0, %c0_i32_1 : i32, i32, i32, i32, i32
  }
}

</mosaic_0001>

<bundles_post_ra>
// kernel: tpu_custom_call.1
= control target key start
LH: loop header
LB: loop body
LE: loop exit
PB: predicated region body
PF: predicated region fallthrough
CT: control target
= control target key end

     0   :  { %7 = vsyncpa [#allocation6], 0  ;;  %s1084_s0 = inlined_call_operand.hbm [shape: f32[2,4,8,128], index: 0, kind: input, shape index: {}]   ;;  %s1085_s1 = inlined_call_operand.hbm [shape: f32[2,4,8,128], index: 1, kind: input, shape index: {}]   ;;  %s1086_s2 = inlined_call_operand.hbm [shape: f32[2,1,3,8,128], index: 2, kind: output, shape index: {}]  }
   0x1   :  { %9 = vsyncpa [#allocation6 + $0x1], 0 }
   0x2   :  { %10 = vsyncpa [#allocation9], 0 }
   0x3   :  { %12 = vsyncpa [#allocation9 + $0x1], 0 }
   0x4   :  { %13 = vsyncpa [#allocation7], 0 }
   0x5   :  { %15 = vsyncpa [#allocation7 + $0x1], 0  ;;  %s823_s9 = smov 0   ;;  %s825_s10 = smov 0  }
   0x6   :  { %s827_s11 = smov 0   ;;  %s829_s12 = smov 0  }
   0x7   :  { %s831_s13 = smov 0   ;;  %s833_s14 = smov 0  }
   0x8 LB: > { %s533_s15 = sadd.s32 4294967295, %s802_s14   ;;  %s534_s16 = sadd.s32 4294967294, %s802_s14   ;;  %s802_s14 = sphi %s833_s14, %s21_s14   ;;  %s798_s13 = sphi %s831_s13, %s1108_s13   ;;  %s794_s12 = sphi %s829_s12, %s1107_s12   ;;  %s790_s11 = sphi %s827_s11, %s1106_s11   ;;  %s786_s10 = sphi %s825_s10, %s1105_s10   ;;  %s782_s9 = sphi %s823_s9, %s1104_s9  }
   0x9   : > { %s40_s17 = sadd.s32 1, %s798_s13  ;;  %s51_s18 = sadd.s32 1, %s790_s11 }
   0xa   : > { %p42_p0 = scmp.ge.s32.totalorder %s40_s17, 2  ;;  %p58_p1 = scmp.ne.s32.totalorder %s790_s11, %s786_s10 }
   0xb   : > { %p59_p2 = scmp.eq.s32.totalorder %s802_s14, 0  ;;  %p64_p3 = scmp.ne.s32.totalorder %s786_s10, %s782_s9 }
   0xc   : > { %s1110_s17 = smov (%p42_p0, %s40_s17), 0  ;;  %p65_p5 = scmp.eq.s32.totalorder %s533_s15, 0 }
   0xd   : > { %p864_p4 = por %p59_p2, %p58_p1  ;;  %s46_s20 = ssub.s32 %s798_s13, %s1110_s17 }
   0xe   : > { %p120_p6 = scmp.eq.s32.totalorder %s533_s15, 1  ;;  %p49_p7 = scmp.eq.s32.totalorder %s46_s20, 0 }
   0xf   : > { %p870_p8 = por %p65_p5, %p64_p3  ;;  %p126_p10 = scmp.eq.s32.totalorder %s534_s16, 1 }
  0x10   : > { %p874_p9 = por %p120_p6, %p58_p1  ;;  %p536_p12 = scmp.ge.s32.totalorder %s802_s14, 2 }
  0x11   : > { %s879_s23 = scalar_select %p49_p7, %s790_s11, %s51_s18  }
  0x12   : > { %p881_p11 = por %p126_p10, %p64_p3  ;;  %p576_p13 = scmp.lt.s32.totalorder %s802_s14, 2 }
  0x13   : > { %s888_s25 = sand.u32 1, %s790_s11   ;;  %s555_s27 = sshll.u32 %s798_s13, 5 }
  0x14   : > { %s537_s26 = sshll.u32 %s888_s25, 5  ;;  %s157_s30 = scalar_lea.hbm %s1084_s0, %s555_s27 }
  0x15   : > { %s150_s3 = scalar_lea.vmem [#allocation5], %s537_s26  ;;  %s158_s5 = sshll.u32 %s157_s30, 4  ;;  %s159_s5 = int_to_ptr.hbm [resolvable:$true] %s158_s5 }
  0x16   : > { %s160_s4 = sshll.u32 %s150_s3, 4  ;;  %p897_p0 = pnand %p576_p13, %p864_p4  ;;  %s161_s4 = int_to_ptr.vmem [resolvable:$true] %s160_s4 }
  0x17   : > { %p543_p1 = scmp.ge.s32.totalorder %s802_s14, 1  ;;  %s147_s7 = scalar_lea.sflag [#allocation6], %s888_s25 }
  0x18   : > { %s804_s8 = smov 128   ;;  %s805_s15 = smov 8  }
  0x19   : > { %568 = dma.hbm_to_vmem [thread:$0]  (!%p897_p0), %s159_s5, 512, %s161_s4, %s147_s7, %s804_s8, %s804_s8, %s805_s15  }
  0x1a   : > { %p192_p2 = scmp.lt.s32.totalorder %s802_s14, 3  ;;  %s181_s20 = scalar_lea.hbm %s1085_s1, %s555_s27 }
  0x1b   : > { %s182_s28 = sshll.u32 %s181_s20, 4  ;;  %s174_s19 = scalar_lea.vmem [#allocation8], %s537_s26  ;;  %s183_s28 = int_to_ptr.hbm [resolvable:$true] %s182_s28 }
  0x1c   : > { %p193_p3 = pnand %p543_p1, %p192_p2  ;;  %s184_s29 = sshll.u32 %s174_s19, 4  ;;  %s185_s29 = int_to_ptr.vmem [resolvable:$true] %s184_s29 }
  0x1d   : > { %s171_s30 = scalar_lea.sflag [#allocation9], %s888_s25  ;;  %s913_s3 = sand.u32 (!%p193_p3), 1, %s786_s10  }
  0x1e   : > { %571 = dma.hbm_to_vmem [thread:$0]  (!%p897_p0), %s183_s28, 512, %s185_s29, %s171_s30, %s804_s8, %s804_s8, %s805_s15  }
  0x1f   : > { %196 = sbr.rel (%p193_p3) target bundleno = 84 (0x54), region = 28  ;;  %s544_s4 = sshll.u32 (!%p193_p3), %s913_s3, 5 }
  0x20   : > { %s199_s5 = scalar_lea.sflag (!%p193_p3), [#allocation6], %s913_s3  ;;  %s202_s7 = scalar_lea.vmem (!%p193_p3), [#allocation5], %s544_s4 }
  0x24   : > { %769 = dma.done.wait (%p870_p8), %s199_s5, 512  }
  0x25   : > { %771 = vsyncadd (%p870_p8), %s199_s5, 4294966784  ;;  %s209_s25 = scalar_lea.sflag [#allocation9], %s913_s3  ;;  %s922_s26 = scalar_lea.vmem [#allocation8], %s544_s4 }
  0x26   : > { %773 = dma.done.wait (%p870_p8), %s209_s25, 512  }
  0x27   : > { %775 = vsyncadd (%p870_p8), %s209_s25, 4294966784  ;;  %v248_v0 = vld [vmem:[%s202_s7] sm:$0xff]  ;;  %v249_v1 = vld [vmem:[%s202_s7 + $0x8] sm:$0xff]  ;;  %s557_s21 = smul.u32 24, %s913_s3  ;;  %s400_s20 = scalar_lea.sflag [#allocation7], %s913_s3 }
  0x28   : > { %v250_v2 = vld [vmem:[%s202_s7 + $0x10] sm:$0xff]  ;;  %v251_v3 = vld [vmem:[%s202_s7 + $0x18] sm:$0xff]  ;;  %v256_v4 = vmax.f32 %v248_v0, %v249_v1  ;;  %v546_v5 = vmul.f32 -1.442695, %v248_v0  ;;  %v547_v7 = vmul.f32 -1.442695, %v249_v1 }
  0x29   : > { %v257_v6 = vmax.f32 %v250_v2, %v251_v3  ;;  %v548_v9 = vmul.f32 -1.442695, %v250_v2  ;;  %v549_v10 = vmul.f32 -1.442695, %v251_v3  ;;  %v935_v15 = vld [vmem:[%s922_s26] sm:$0xff]  ;;  %v938_v16 = vld [vmem:[%s922_s26 + $0x8] sm:$0xff] }
  0x2a   : > { %630 = vpow2.f32 %v546_v5  ;;  %v943_v24 = vld [vmem:[%s922_s26 + $0x10] sm:$0xff]  ;;  %v277_v25 = vadd.f32 %v938_v16, %v935_v15  ;;  %v280_v26 = vmul.f32 %v935_v15, %v248_v0  ;;  %v281_v27 = vmul.f32 %v938_v16, %v249_v1  ;;  %v960_v37 = vld [vmem:[%s922_s26 + $0x18] sm:$0xff]  ;;  %s558_s27 = smul.u32 24, %s794_s12  ;;  %s238_s15 = scalar_lea.vmem [#allocation10], %s557_s21 }
  0x2b   : > { %v928_v8 = vmax.f32 %v256_v4, %v257_v6  ;;  %632 = vpow2.f32 %v547_v7  ;;  %v282_v31 = vmul.f32 %v943_v24, %v250_v2  ;;  %v969_v44 = vmul.f32 %v960_v37, %v251_v3  ;;  %s414_s16 = sshll.u32 %s238_s15, 4  ;;  %s736_s4 = scalar_lea.hbm %s1086_s2, 48  ;;  %s415_s16 = int_to_ptr.vmem [resolvable:$true] %s414_s16 }
  0x2c   : > { %634 = vpow2.f32 %v548_v9  ;;  %v278_v33 = vadd.f32 %v277_v25, %v943_v24  ;;  %v284_v34 = vadd.f32 %v281_v27, %v280_v26  ;;  %s413_s8 = scalar_lea.hbm %s1086_s2, %s558_s27 }
  0x2d   : > { %v259_v11 = vsub.f32 %v248_v0, %v928_v8  ;;  %v260_v12 = vsub.f32 %v249_v1, %v928_v8  ;;  %v261_v13 = vsub.f32 %v250_v2, %v928_v8  ;;  %v262_v14 = vsub.f32 %v251_v3, %v928_v8  ;;  %s416_s18 = sshll.u32 %s413_s8, 4  ;;  %s417_s18 = int_to_ptr.hbm [resolvable:$true] %s416_s18 }
  0x2e   : > { %636 = vpow2.f32 %v549_v10  ;;  %v966_v43 = vadd.f32 %v278_v33, %v960_v37  ;;  %v971_v45 = vadd.f32 %v284_v34, %v282_v31  ;;  %s730_s28 = sshra.s32 %s417_s18, 4  ;;  %s731_s28 = int_to_ptr.hbm [resolvable:$true] %s730_s28 }
  0x2f   : > { %v263_v17 = vmul.f32 1.442695, %v259_v11  ;;  %v265_v18 = vmul.f32 1.442695, %v260_v12  ;;  %v267_v19 = vmul.f32 1.442695, %v261_v13  ;;  %p737_p7 = scmp.lt.s32.totalorder %s731_s28, %s1086_s2 }
  0x30   : > { %v631_v20 = vpop.eup %630  ;;  %v269_v21 = vmul.f32 1.442695, %v262_v14  ;;  %s732_s19 = scalar_lea.hbm %s731_s28, 24 }
  0x31   : > { %638 = vpow2.f32 %v263_v17  ;;  %v940_v22 = vadd.f32 1.0, %v631_v20  ;;  %v633_v23 = vpop.eup %632  ;;  %p733_p4 = scmp.ne.s32.totalorder %s731_s28, %s732_s19  ;;  %p738_p8 = scmp.lt.s32.totalorder %s736_s4, %s732_s19 }
  0x32   : > { %640 = vpow2.f32 %v265_v18  ;;  %v949_v28 = vadd.f32 1.0, %v633_v23  ;;  %v635_v29 = vpop.eup %634 }
  0x33   : > { %642 = vpow2.f32 %v267_v19  ;;  %v952_v32 = vadd.f32 1.0, %v635_v29  ;;  %v316_v38 = vand.u32 2147483648, %v940_v22  ;;  %vm310_vm0 = vweird.f32 %v940_v22  ;;  %p734_p5 = pnand %p733_p4, %p874_p9  ;;  %p739_p10 = por %p738_p8, %p737_p7 }
  0x34   : > { %644 = vpow2.f32 %v269_v21  ;;  %v637_v30 = vpop.eup %636  ;;  %v314_v48 = vand.u32 2147483647, %v940_v22  ;;  %vm325_vm1 = vweird.f32 %v949_v28  ;;  %v329_v52 = vand.u32 2147483647, %v949_v28 }
  0x35   : > { %646 = vrcp.f32 %v940_v22  ;;  %v956_v35 = vadd.f32 1.0, %v637_v30  ;;  %v317_v49 = vor.u32 1.1754944e-38, %v316_v38  ;;  %v331_v53 = vand.u32 2147483648, %v949_v28  ;;  %p735_p6 = pneg %p734_p5 }
  0x36   : > { %648 = vrcp.f32 %v949_v28  ;;  %vm340_vm2 = vweird.f32 %v952_v32  ;;  %v344_v57 = vand.u32 2147483647, %v952_v32  ;;  %v346_v58 = vand.u32 2147483648, %v952_v32 }
  0x37   : > { %v639_v36 = vpop.eup %638  ;;  %650 = vrcp.f32 %v952_v32  ;;  %vm355_vm4 = vweird.f32 %v956_v35  ;;  %v361_v2 = vand.u32 2147483648, %v956_v35  ;;  %v359_v6 = vand.u32 2147483647, %v956_v35  ;;  %p740_p13 = pnand %p739_p10, %p735_p6 }
  0x38   : > { %v641_v39 = vpop.eup %640  ;;  %652 = vrcp.f32 %v956_v35  ;;  %vm994_vm9 = vcmp.eq.f32.partialorder %v314_v48, 8.507059e+37  ;;  %v332_v11 = vor.u32 1.1754944e-38, %v331_v53  ;;  %vm1005_vm11 = vcmp.eq.f32.partialorder %v329_v52, 8.507059e+37 }
  0x39   : > { %v643_v40 = vpop.eup %642  ;;  %v271_v41 = vadd.f32 %v641_v39, %v639_v36  ;;  %v347_v18 = vor.u32 1.1754944e-38, %v346_v58  ;;  %vm345_vm13 = vcmp.eq.f32.partialorder %v344_v57, 8.507059e+37  ;;  %v362_v23 = vor.u32 1.1754944e-38, %v361_v2 }
  0x3a   : > { %v645_v42 = vpop.eup %644  ;;  %vm360_vm15 = vcmp.eq.f32.partialorder %v359_v6, 8.507059e+37  ;;  %v286_v39 = vadd.f32 %v971_v45, %v969_v44 }
  0x3b   : > { %v647_v46 = vpop.eup %646  ;;  %v272_v47 = vadd.f32 %v643_v40, %v271_v41 }
  0x3c   : > { %v649_v50 = vpop.eup %648  ;;  %v306_v51 = vmul.f32 %v647_v46, %v940_v22  ;;  %vm311_vm3 = vweird.f32 %v647_v46 }
  0x3d   : > { %v651_v54 = vpop.eup %650  ;;  %v273_v55 = vadd.f32 %v645_v42, %v272_v47  ;;  %v321_v56 = vmul.f32 %v649_v50, %v949_v28  ;;  %vm326_vm5 = vweird.f32 %v649_v50  ;;  %vm989_vm7 = vmor %vm310_vm0, %vm311_vm3 }
  0x3e   : > { %v653_v59 = vpop.eup %652  ;;  %v307_v60 = vsub.f32 1.0, %v306_v51  ;;  %v336_v61 = vmul.f32 %v651_v54, %v952_v32  ;;  %vm341_vm6 = vweird.f32 %v651_v54  ;;  %vm1000_vm10 = vmor %vm325_vm1, %vm326_vm5 }
  0x3f   : > { %654 = vlog2.f32 %v273_v55  ;;  %v322_v62 = vsub.f32 1.0, %v321_v56  ;;  %v351_v63 = vmul.f32 %v653_v59, %v956_v35  ;;  %vm356_vm8 = vweird.f32 %v653_v59  ;;  %vm1012_vm12 = vmor %vm340_vm2, %vm341_vm6 }
  0x40   : > { %v308_v0 = vmul.f32 %v647_v46, %v307_v60  ;;  %v337_v1 = vsub.f32 1.0, %v336_v61  ;;  %vm1021_vm14 = vmor %vm355_vm4, %vm356_vm8 }
  0x41   : > { %v323_v4 = vmul.f32 %v649_v50, %v322_v62  ;;  %v352_v5 = vsub.f32 1.0, %v351_v63 }
  0x42   : > { %v309_v7 = vadd.f32 %v647_v46, %v308_v0  ;;  %v338_v12 = vmul.f32 %v651_v54, %v337_v1 }
  0x43   : > { %v324_v13 = vadd.f32 %v649_v50, %v323_v4  ;;  %v353_v19 = vmul.f32 %v653_v59, %v352_v5 }
  0x44   : > { %v313_v20 = vsel %vm989_vm7, %v647_v46, %v309_v7  ;;  %v339_v21 = vadd.f32 %v651_v54, %v338_v12 }
  0x45   : > { %v655_v25 = vpop.eup %654  ;;  %v318_v26 = vsel %vm994_vm9, %v317_v49, %v313_v20  ;;  %v328_v27 = vsel %vm1000_vm10, %v649_v50, %v324_v13  ;;  %v354_v28 = vadd.f32 %v653_v59, %v353_v19 }
  0x46   : > { %v275_v29 = vmul.f32 0.6931472, %v655_v25  ;;  %v333_v30 = vsel %vm1005_vm11, %v332_v11, %v328_v27  ;;  %v343_v31 = vsel %vm1012_vm12, %v651_v54, %v339_v21  ;;  %v365_v32 = vmul.f32 %v318_v26, %v935_v15 }
  0x47   : > { %v348_v33 = vsel %vm345_vm13, %v347_v18, %v343_v31  ;;  %v358_v34 = vsel %vm1021_vm14, %v653_v59, %v354_v28  ;;  %v366_v35 = vmul.f32 %v333_v30, %v938_v16  ;;  %v372_v36 = vadd.f32 %v333_v30, %v318_v26 }
  0x48   : > { %v276_v38 = vadd.f32 %v275_v29, %v928_v8  ;;  %v363_v40 = vsel %vm360_vm15, %v362_v23, %v358_v34  ;;  %v367_v41 = vmul.f32 %v348_v33, %v943_v24 }
  0x49   : > { %v368_v15 = vmul.f32 %v363_v40, %v960_v37  ;;  %v369_v42 = vadd.f32 %v366_v35, %v365_v32  ;;  %v373_v46 = vadd.f32 %v372_v36, %v348_v33 }
  0x4a   : > { %v287_v16 = vmul.f32 %v966_v43, %v276_v38 }
  0x4b   : > { %v370_v8 = vadd.f32 %v369_v42, %v367_v41  ;;  %v374_v44 = vadd.f32 %v373_v46, %v363_v40 }
  0x4c   : > { %v288_v45 = vsub.f32 %v287_v16, %v286_v39 }
  0x4d   : > { %v371_v24 = vadd.f32 %v370_v8, %v368_v15  ;;  %v375_v47 = vadd.f32 %v374_v44, %v966_v43 }
  0x4e   : > { %392 = vst [vmem:[%s238_s15] sm:$0xff] %v288_v45 }
  0x4f   : > { %550 = vst [vmem:[%s238_s15 + $0x8] sm:$0xff] %v371_v24 }
  0x50   : > { %551 = vst [vmem:[%s238_s15 + $0x10] sm:$0xff] %v375_v47 }
  0x51   : > { %743 = shalt.err (!%p740_p13)
}
  0x52   : > { %s806_s3 = smov 128   ;;  %s807_s25 = smov 8  }
  0x53   : > { %563 = dma.vmem_to_hbm [thread:$0]  (%p874_p9), %s415_s16, 384, %s417_s18, %s400_s20, %s806_s3, %s806_s3, %s807_s25  }
  0x54 PF: > { %s431_s26 = sand.u32 1, %s782_s9   ;;  %p573_p0 = pnand %p536_p12, %p881_p11 }
  0x55   : > { %s432_s21 = scalar_lea.sflag [#allocation7], %s431_s26 }
  0x56   : > { %p574_p1 = pneg %p573_p0 }
  0x58   : > { %777 = dma.done.wait (%p574_p1), %s432_s21, 384  }
  0x59   : > { %779 = vsyncadd (%p574_p1), %s432_s21, 4294966912  ;;  %s21_s14 = sadd.s32 1, %s802_s14   ;;  %s1104_s9 = smov %s786_s10 }
  0x5a   : > { %p18_p2 = scmp.ge.s32.totalorder %s21_s14, 4   ;;  %s1105_s10 = smov %s790_s11 }
  0x5b   : > { %s1106_s11 = smov %s879_s23  ;;  %s1107_s12 = smov %s798_s13 }
  0x5c   : > { %s1108_s13 = smov %s1110_s17  ;;  %20 = sbr.rel (!%p18_p2) target bundleno = 8 (0x8), region = 96 }
  0x61   :  { %438 = vsyncpa [#allocation6], 1 }
  0x62   :  { %440 = vsyncpa [#allocation6 + $0x1], 1 }
  0x63   :  { %441 = vsyncpa [#allocation9], 1 }
  0x64   :  { %443 = vsyncpa [#allocation9 + $0x1], 1 }
  0x65   :  { %444 = vsyncpa [#allocation7], 1 }
  0x66   :  { %446 = vsyncpa [#allocation7 + $0x1], 1 }

</bundles_post_ra>
